<compile_context>
chip_gen: v6e
topology: v6e:2x2x1
jax: 0.10.0
libtpu: 0.0.40
codegen_flags: <defaults>
</compile_context>

<pallas_src>
import functools

import jax
import jax.numpy as jnp
from jax.experimental import pallas as pl
from jax.experimental.pallas import tpu as pltpu


# ------------------------------ tiling helpers ------------------------------

_TB_CAP = 512                      # batch-tile cap (lane axis of logits / outputs)
_TK_CAP = 2048                     # feature-tile cap (contraction axis)
_LANE = 128
_VMEM_LIMIT = 32 * 1024 * 1024     # > v5e 16 MiB scoped default; within v7x 64 MiB physical


def _cdiv(a, b):
    return -(-a // b)


def _round_up(n, m):
    return _cdiv(n, m) * m


def _tile(extent, cap, align=_LANE):
    """Padding-minimizing aligned tile: n_tiles = ceil(extent/cap), tile = round_up(extent/n, align)."""
    n = _cdiv(extent, cap)
    t = _round_up(_cdiv(extent, n), align)
    return t, t * n                 # (tile, padded_extent)


def _pad2d(a, rows, cols):
    pr, pc = rows - a.shape[0], cols - a.shape[1]
    if pr == 0 and pc == 0:
        return a
    return jnp.pad(a, ((0, pr), (0, pc)))


# ------------------------------- kernels ------------------------------------

def _predict_kernel(x_ref, w_ref, b_ref, idx_ref, acc_ref):
    k = pl.program_id(1)

    @pl.when(k == 0)
    def _init():
        # init the (C, TB) accumulator with the broadcast bias -> no bias add at finalize
        acc_ref[...] = jnp.broadcast_to(b_ref[...], acc_ref.shape)

    # z += W_tile[C,TK] . x_tile[TB,TK]^T  expressed directly via dimension numbers
    # (transpose_rhs form) -> no materialized XLU transpose, pure MXU work, f32 accumulation.
    acc_ref[...] += jax.lax.dot_general(
        w_ref[...], x_ref[...],
        (((1,), (1,)), ((), ())),
        preferred_element_type=jnp.float32,
    )

    @pl.when(k == pl.num_programs(1) - 1)
    def _finalize():
        z = acc_ref[...]                                        # (C, TB) logits
        # sigmoid dropped: argmax(sigmoid(z)) == argmax(z) (monotone) -> no EUP work.
        num_classes = z.shape[0]
        m = jnp.max(z, axis=0, keepdims=True)                   # (1, TB)
        cls = jax.lax.broadcasted_iota(jnp.int32, z.shape, 0)   # class id per sublane
        first_max = jnp.min(jnp.where(z == m, cls, num_classes),
                            axis=0, keepdims=True)              # first occurrence, like argmax
        idx_ref[...] = first_max.astype(jnp.int32)              # lane-dense (1, TB)


def _loss_kernel(x_ref, w_ref, b_ref, y_ref, nll_ref, acc_ref):
    k = pl.program_id(1)

    @pl.when(k == 0)
    def _init():
        acc_ref[...] = jnp.broadcast_to(b_ref[...], acc_ref.shape)

    acc_ref[...] += jax.lax.dot_general(
        w_ref[...], x_ref[...],
        (((1,), (1,)), ((), ())),
        preferred_element_type=jnp.float32,
    )

    @pl.when(k == pl.num_programs(1) - 1)
    def _finalize():
        # loss path keeps the sigmoid (faithful to the PyTorch module:
        # cross_entropy applied on top of sigmoid outputs).
        y_pre = jax.nn.sigmoid(acc_ref[...])                    # (C, TB)
        m = jnp.max(y_pre, axis=0, keepdims=True)
        lse = jnp.log(jnp.sum(jnp.exp(y_pre - m), axis=0, keepdims=True)) + m
        cls = jax.lax.broadcasted_iota(jnp.int32, y_pre.shape, 0)
        sel = jnp.sum(jnp.where(cls == y_ref[...], y_pre, 0.0),
                      axis=0, keepdims=True)                    # y_pre[y_b, b]
        # per-sample NLL, lane-dense (1, TB); the mean over the real batch happens outside,
        # which keeps the batch grid axis "parallel" (both v7x TensorCores usable).
        nll_ref[...] = lse - sel


# ------------------------------ Python wrapper ------------------------------

class PallasTorchModel:
    """Pallas/TPU re-implementation of TorchModel(input_size, category_num).

    mxu_dtype defaults to bfloat16 on every TPU generation (the kernel is HBM-bound on the
    x stream, so the bf16 feed halves DMA bytes); accumulation is always float32.
    Pass mxu_dtype=jnp.float32 for bit-tighter numerics.
    """

    def __init__(self, input_size, category_num, key, mxu_dtype=jnp.bfloat16):
        self.input_size = int(input_size)
        self.category_num = int(category_num)
        self.mxu_dtype = mxu_dtype

        kw, kb = jax.random.split(key)
        # deterministic init mimicking nn.Linear default U(-1/sqrt(D), 1/sqrt(D))
        bound = 1.0 / (input_size ** 0.5)
        self.w = jax.random.uniform(kw, (category_num, input_size),
                                    jnp.float32, -bound, bound)   # (C, D), native layout
        self.b = jax.random.uniform(kb, (category_num,),
                                    jnp.float32, -bound, bound)   # (C,)

        self.tk, self.d_pad = _tile(self.input_size, _TK_CAP)
        # device copies: K zero-padded (contributes 0 to the matmul), MXU feed dtype,
        # bias kept as an f32 column.
        self._w_dev = _pad2d(self.w, category_num, self.d_pad).astype(mxu_dtype)  # (C, D_pad)
        self._b_dev = self.b.reshape(category_num, 1)                             # (C, 1) f32

    # -- inference: argmax over classes --------------------------------------
    @functools.partial(jax.jit, static_argnums=0)
    def _predict(self, x):
        batch = x.shape[0]
        tb, b_pad = _tile(batch, _TB_CAP)
        nb, nk = b_pad // tb, self.d_pad // self.tk
        c = self.category_num

        # fused pad + cast to the MXU feed dtype (one XLA copy); x stays (B, D) -- no transpose
        x_p = _pad2d(x, b_pad, self.d_pad).astype(self.mxu_dtype)

        idx = pl.pallas_call(
            _predict_kernel,
            out_shape=jax.ShapeDtypeStruct((1, b_pad), jnp.int32),
            grid=(nb, nk),
            in_specs=[
                pl.BlockSpec((tb, self.tk), lambda i, k: (i, k)),    # x tile (native layout)
                pl.BlockSpec((c, self.tk), lambda i, k: (0, k)),     # W tile (full C)
                pl.BlockSpec((c, 1), lambda i, k: (0, 0)),           # bias column
            ],
            out_specs=pl.BlockSpec((1, tb), lambda i, k: (0, i)),    # lane-dense indices
            scratch_shapes=[pltpu.VMEM((c, tb), jnp.float32)],       # logits accumulator
            compiler_params=pltpu.CompilerParams(
                dimension_semantics=("parallel", "arbitrary"),       # batch-parallel (v7x 2 TCs)
                vmem_limit_bytes=_VMEM_LIMIT),
        )(x_p, self._w_dev, self._b_dev)
        return idx[0, :batch]

    # -- training: scalar cross-entropy ---------------------------------------
    @functools.partial(jax.jit, static_argnums=0)
    def _loss(self, x, y):
        batch = x.shape[0]
        tb, b_pad = _tile(batch, _TB_CAP)
        nb, nk = b_pad // tb, self.d_pad // self.tk
        c = self.category_num

        x_p = _pad2d(x, b_pad, self.d_pad).astype(self.mxu_dtype)
        y_p = _pad2d(y.astype(jnp.int32).reshape(1, batch), 1, b_pad)   # lane-dense labels

        nll = pl.pallas_call(
            _loss_kernel,
            out_shape=jax.ShapeDtypeStruct((1, b_pad), jnp.float32),    # per-sample NLL
            grid=(nb, nk),
            in_specs=[
                pl.BlockSpec((tb, self.tk), lambda i, k: (i, k)),    # x tile
                pl.BlockSpec((c, self.tk), lambda i, k: (0, k)),     # W tile
                pl.BlockSpec((c, 1), lambda i, k: (0, 0)),           # bias column
                pl.BlockSpec((1, tb), lambda i, k: (0, i)),          # labels (lane-dense)
            ],
            out_specs=pl.BlockSpec((1, tb), lambda i, k: (0, i)),    # lane-dense NLL row
            scratch_shapes=[pltpu.VMEM((c, tb), jnp.float32)],
            compiler_params=pltpu.CompilerParams(
                dimension_semantics=("parallel", "arbitrary"),       # batch-parallel loss too
                vmem_limit_bytes=_VMEM_LIMIT),
        )(x_p, self._w_dev, self._b_dev, y_p)
        # mean over the real (unpadded) batch -- trivial XLA reduction over B floats
        return jnp.mean(nll[0, :batch])

    def __call__(self, x, y=None):
        if y is None:
            return self._predict(x)          # == sigmoid(xW^T + b).argmax(dim=1)
        return self._loss(x, y)              # == F.cross_entropy(sigmoid(xW^T + b), y)


# ----------------------------------- main -----------------------------------

if __name__ == "__main__":
    key = jax.random.PRNGKey(0)
    k_param, k_x, k_y = jax.random.split(key, 3)

    # small shapes consistent with the module
    batch, input_size, category_num = 8, 32, 8

    # f32 MXU feed instance for tight numeric checks
    model = PallasTorchModel(input_size, category_num, k_param, mxu_dtype=jnp.float32)

    x = jax.random.normal(k_x, (batch, input_size), jnp.float32)
    y = jax.random.randint(k_y, (batch,), 0, category_num, jnp.int32)

    preds = model(x)          # inference branch -> predicted class indices
    loss = model(x, y)        # training branch  -> scalar cross-entropy
    jax.block_until_ready((preds, loss))

    # pure-JAX reference (matches the PyTorch module semantics)
    z_ref = jnp.dot(x, model.w.T, precision=jax.lax.Precision.HIGHEST) + model.b
    y_pre_ref = jax.nn.sigmoid(z_ref)
    preds_ref = jnp.argmax(y_pre_ref, axis=1)
    loss_ref = -jnp.mean(jax.nn.log_softmax(y_pre_ref, axis=1)[jnp.arange(batch), y])

    assert preds.shape == (batch,) and preds.dtype == jnp.int32
    assert bool(jnp.all(preds == preds_ref)), (preds, preds_ref)
    assert bool(jnp.allclose(loss, loss_ref, atol=1e-4)), (loss, loss_ref)

    # exercise the multi-tile grid path (batch > TB cap, D > TK cap) with tolerant checks
    batch2, input_size2 = 700, 3000
    model2 = PallasTorchModel(input_size2, category_num, k_param, mxu_dtype=jnp.float32)
    x2 = jax.random.normal(jax.random.PRNGKey(1), (batch2, input_size2), jnp.float32)
    y2 = jax.random.randint(jax.random.PRNGKey(2), (batch2,), 0, category_num, jnp.int32)
    preds2 = model2(x2)
    loss2 = model2(x2, y2)
    jax.block_until_ready((preds2, loss2))
    z2_ref = jnp.dot(x2, model2.w.T, precision=jax.lax.Precision.HIGHEST) + model2.b
    yp2_ref = jax.nn.sigmoid(z2_ref)
    preds2_ref = jnp.argmax(yp2_ref, axis=1)
    loss2_ref = -jnp.mean(jax.nn.log_softmax(yp2_ref, axis=1)[jnp.arange(batch2), y2])
    assert preds2.shape == (batch2,)
    assert float(jnp.mean((preds2 == preds2_ref).astype(jnp.float32))) > 0.95
    assert bool(jnp.allclose(loss2, loss2_ref, atol=5e-3)), (loss2, loss2_ref)

    # default bf16 MXU feed (recommended on all generations) -- loose numeric check.
    # Note: bf16 rounding can reorder argmax near-ties relative to the f32 reference.
    model_bf16 = PallasTorchModel(input_size, category_num, k_param)   # bf16 default
    preds_bf = model_bf16(x)
    loss_bf = model_bf16(x, y)
    jax.block_until_ready((preds_bf, loss_bf))
    assert bool(jnp.all((preds_bf >= 0) & (preds_bf < category_num)))
    assert bool(jnp.allclose(loss_bf, loss_ref, atol=5e-2)), (loss_bf, loss_ref)

    print("KERNEL_OK")
</pallas_src>

<mosaic_0001>
module attributes {stable_mosaic.version = 11 : i64} {
  func.func @_predict_kernel(%arg0: i32, %arg1: i32, %arg2: memref<128x128xf32, #tpu.memory_space<vmem>>, %arg3: memref<8x128xf32, #tpu.memory_space<vmem>>, %arg4: memref<8x1xf32, #tpu.memory_space<vmem>>, %arg5: memref<1x128xi32, #tpu.memory_space<vmem>>, %arg6: memref<8x128xf32, #tpu.memory_space<vmem>>) attributes {dimension_semantics = [#tpu.dimension_semantics<parallel>, #tpu.dimension_semantics<arbitrary>], iteration_bounds = array<i64: 1, 1>, scalar_prefetch = 0 : i64, scratch_operands = 1 : i64, tpu.core_type = #tpu.core_type<tc>, window_params = [{transform_indices = @transform_0, window_bounds = array<i64: 128, 128>}, {transform_indices = @transform_1, window_bounds = array<i64: 8, 128>}, {pipeline_mode = #tpu.pipeline_mode<synchronous>, transform_indices = @transform_2, window_bounds = array<i64: 8, 1>}, {transform_indices = @transform_3, window_bounds = array<i64: 1, 128>}]} {
    %c0_i32 = arith.constant 0 : i32
    %0 = arith.cmpi eq, %arg1, %c0_i32 : i32
    %1 = arith.extui %0 : i1 to i32
    %c0_i32_0 = arith.constant 0 : i32
    %2 = arith.cmpi ne, %1, %c0_i32_0 : i32
    scf.if %2 {
      %c0_10 = arith.constant 0 : index
      %c0_11 = arith.constant 0 : index
      %12 = vector.load %arg4[%c0_10, %c0_11] : memref<8x1xf32, #tpu.memory_space<vmem>>, vector<8x1xf32>
      %13 = vector.shape_cast %12 : vector<8x1xf32> to vector<8x1xf32>
      %14 = vector.broadcast %13 : vector<8x1xf32> to vector<8x128xf32>
      %c0_12 = arith.constant 0 : index
      %c0_13 = arith.constant 0 : index
      %15 = vector.load %arg6[%c0_12, %c0_13] : memref<8x128xf32, #tpu.memory_space<vmem>>, vector<8x128xf32>
      tpu.vector_store %arg6[%c0_12, %c0_13], %14 {strides = array<i32>} : memref<8x128xf32, #tpu.memory_space<vmem>>, vector<8x128xf32>,
    } else {
    }
    %c0 = arith.constant 0 : index
    %c0_1 = arith.constant 0 : index
    %3 = vector.load %arg6[%c0, %c0_1] : memref<8x128xf32, #tpu.memory_space<vmem>>, vector<8x128xf32>
    %c0_2 = arith.constant 0 : index
    %c0_3 = arith.constant 0 : index
    %4 = vector.load %arg3[%c0_2, %c0_3] : memref<8x128xf32, #tpu.memory_space<vmem>>, vector<8x128xf32>
    %c0_4 = arith.constant 0 : index
    %c0_5 = arith.constant 0 : index
    %5 = vector.load %arg2[%c0_4, %c0_5] : memref<128x128xf32, #tpu.memory_space<vmem>>, vector<128x128xf32>
    %cst = arith.constant dense<0.000000e+00> : vector<8x128xf32>
    %6 = tpu.matmul %4, %5, %cst {dimension_numbers = #tpu.dot_dimension_numbers<[1], [1], [0], [0], [0, 0, 1, 0], [], []>} : vector<8x128xf32>, vector<128x128xf32>, vector<8x128xf32> -> vector<8x128xf32>
    %7 = arith.addf %3, %6 : vector<8x128xf32>
    %c0_6 = arith.constant 0 : index
    %c0_7 = arith.constant 0 : index
    %8 = vector.load %arg6[%c0_6, %c0_7] : memref<8x128xf32, #tpu.memory_space<vmem>>, vector<8x128xf32>
    tpu.vector_store %arg6[%c0_6, %c0_7], %7 {strides = array<i32>} : memref<8x128xf32, #tpu.memory_space<vmem>>, vector<8x128xf32>,
    %c0_i32_8 = arith.constant 0 : i32
    %9 = arith.cmpi eq, %arg1, %c0_i32_8 : i32
    %10 = arith.extui %9 : i1 to i32
    %c0_i32_9 = arith.constant 0 : i32
    %11 = arith.cmpi ne, %10, %c0_i32_9 : i32
    scf.if %11 {
      %c0_10 = arith.constant 0 : index
      %c0_11 = arith.constant 0 : index
      %12 = vector.load %arg6[%c0_10, %c0_11] : memref<8x128xf32, #tpu.memory_space<vmem>>, vector<8x128xf32>
      %cst_12 = arith.constant dense<0xFF800000> : vector<128xf32>
      %13 = vector.multi_reduction <maximumf>, %12, %cst_12 [0] : vector<8x128xf32> to vector<128xf32>
      %14 = vector.shape_cast %13 : vector<128xf32> to vector<1x128xf32>
      %15 = tpu.iota {dimensions = array<i32: 0>} : vector<8x128xi32>
      %16 = vector.broadcast %14 : vector<1x128xf32> to vector<8x128xf32>
      %17 = arith.cmpf oeq, %12, %16 : vector<8x128xf32>
      %c8_i32 = arith.constant 8 : i32
      %18 = vector.broadcast %c8_i32 : i32 to vector<8x128xi32>
      %19 = arith.select %17, %15, %18 : vector<8x128xi1>, vector<8x128xi32>
      %cst_13 = arith.constant dense<2147483647> : vector<128xi32>
      %20 = vector.multi_reduction <minsi>, %19, %cst_13 [0] : vector<8x128xi32> to vector<128xi32>
      %21 = vector.shape_cast %20 : vector<128xi32> to vector<1x128xi32>
      %c0_14 = arith.constant 0 : index
      %c0_15 = arith.constant 0 : index
      %22 = vector.load %arg5[%c0_14, %c0_15] : memref<1x128xi32, #tpu.memory_space<vmem>>, vector<1x128xi32>
      tpu.vector_store %arg5[%c0_14, %c0_15], %21 {strides = array<i32>} : memref<1x128xi32, #tpu.memory_space<vmem>>, vector<1x128xi32>,
    } else {
    }
    return
  }
  func.func @transform_0(%arg0: i32, %arg1: i32) -> (i32, i32) {
    %c0_i32 = arith.constant 0 : i32
    return %arg0, %arg1 : i32, i32
  }
  func.func @transform_1(%arg0: i32, %arg1: i32) -> (i32, i32) {
    %c0_i32 = arith.constant 0 : i32
    %c0_i32_0 = arith.constant 0 : i32
    return %c0_i32, %arg1 : i32, i32
  }
  func.func @transform_2(%arg0: i32, %arg1: i32) -> (i32, i32) {
    %c0_i32 = arith.constant 0 : i32
    %c0_i32_0 = arith.constant 0 : i32
    %c0_i32_1 = arith.constant 0 : i32
    return %c0_i32, %c0_i32_0 : i32, i32
  }
  func.func @transform_3(%arg0: i32, %arg1: i32) -> (i32, i32) {
    %c0_i32 = arith.constant 0 : i32
    %c0_i32_0 = arith.constant 0 : i32
    return %c0_i32, %arg0 : i32, i32
  }
}

</mosaic_0001>

<bundles_post_ra>
// kernel: _predict.1
= control target key start
LH: loop header
LB: loop body
LE: loop exit
PB: predicated region body
PF: predicated region fallthrough
CT: control target
= control target key end

     0   :  { %v199_v0 = vmov 0.0   ;;  %vm200_vm0 = vmmov 0   ;;  %v201_v2 = vmov 0   ;;  %v125_v27 = vlaneseq  ;;  %s279_s0 = inlined_call_operand.vmem [shape: f32[128,128], index: 0, kind: input, shape index: {}]   ;;  %s280_s2 = inlined_call_operand.vmem [shape: f32[8,1], index: 2, kind: input, shape index: {}]   ;;  %s281_s1 = inlined_call_operand.vmem [shape: f32[8,128], index: 1, kind: input, shape index: {}]   ;;  %s282_s3 = inlined_call_operand.vmem [shape: s32[1,128], index: 3, kind: output, shape index: {}]  }
   0x1   :  { %160 = vmatprep.subr.mxu0 %v199_v0  ;;  %v42_v1 = vld [vmem:[%s279_s0 + $0x78] sm:$0xff]  ;;  %192 = vmatprep.mubr.msk.f32.mxu0 %vm200_vm0, %v199_v0  ;;  %v41_v3 = vld [vmem:[%s279_s0 + $0x70] sm:$0xff]  ;;  %v18_v4 = vld [vmem:[%s280_s2] sm:$0xff] }
   0x2   :  { %161 = vmatpush3.xpose.msra.mxu0 %v42_v1  ;;  %198 = vset.pattern.permute.xlu0 %v201_v2  ;;  %v40_v5 = vld [vmem:[%s279_s0 + $0x68] sm:$0xff]  ;;  %v39_v6 = vld [vmem:[%s279_s0 + $0x60] sm:$0xff]  ;;  %v38_v7 = vld [vmem:[%s279_s0 + $0x58] sm:$0xff]  ;;  %v126_v30 = vshrl.u32 %v125_v27, 7 }
   0x3   :  { %162 = vmatprep.subr.mxu0 %v199_v0  ;;  %21 = vperm.xlu0 %198, %v18_v4   ;;  %v37_v8 = vld [vmem:[%s279_s0 + $0x50] sm:$0xff]  ;;  %v36_v9 = vld [vmem:[%s279_s0 + $0x48] sm:$0xff]  ;;  %v35_v10 = vld [vmem:[%s279_s0 + $0x40] sm:$0xff] }
   0x4   :  { %v34_v11 = vld [vmem:[%s279_s0 + $0x38] sm:$0xff]  ;;  %v33_v12 = vld [vmem:[%s279_s0 + $0x30] sm:$0xff]  ;;  %v32_v13 = vld [vmem:[%s279_s0 + $0x28] sm:$0xff] }
   0x5   :  { %v31_v14 = vld [vmem:[%s279_s0 + $0x20] sm:$0xff]  ;;  %v30_v15 = vld [vmem:[%s279_s0 + $0x18] sm:$0xff]  ;;  %v29_v16 = vld [vmem:[%s279_s0 + $0x10] sm:$0xff] }
   0x6   :  { %163 = vmatpush3.xpose.msra.mxu0 %v41_v3  ;;  %v28_v17 = vld [vmem:[%s279_s0 + $0x8] sm:$0xff]  ;;  %v27_v18 = vld [vmem:[%s279_s0] sm:$0xff] }
   0x7   :  { %164 = vmatprep.subr.mxu0 %v199_v0  ;;  %v26_v19 = vld [vmem:[%s281_s1] sm:$0xff] }
   0xa   :  { %165 = vmatpush3.xpose.msra.mxu0 %v40_v5 }
   0xb   :  { %166 = vmatprep.subr.mxu0 %v199_v0 }
   0xe   :  { %167 = vmatpush3.xpose.msra.mxu0 %v39_v6 }
   0xf   :  { %168 = vmatprep.subr.mxu0 %v199_v0 }
  0x12   :  { %169 = vmatpush3.xpose.msra.mxu0 %v38_v7 }
  0x13   :  { %170 = vmatprep.subr.mxu0 %v199_v0 }
  0x16   :  { %171 = vmatpush3.xpose.msra.mxu0 %v37_v8 }
  0x17   :  { %172 = vmatprep.subr.mxu0 %v199_v0 }
  0x1a   :  { %173 = vmatpush3.xpose.msra.mxu0 %v36_v9 }
  0x1b   :  { %174 = vmatprep.subr.mxu0 %v199_v0 }
  0x1e   :  { %175 = vmatpush3.xpose.msra.mxu0 %v35_v10 }
  0x1f   :  { %176 = vmatprep.subr.mxu0 %v199_v0 }
  0x22   :  { %177 = vmatpush3.xpose.msra.mxu0 %v34_v11 }
  0x23   :  { %178 = vmatprep.subr.mxu0 %v199_v0 }
  0x26   :  { %179 = vmatpush3.xpose.msra.mxu0 %v33_v12 }
  0x27   :  { %180 = vmatprep.subr.mxu0 %v199_v0 }
  0x2a   :  { %181 = vmatpush3.xpose.msra.mxu0 %v32_v13 }
  0x2b   :  { %182 = vmatprep.subr.mxu0 %v199_v0 }
  0x2e   :  { %183 = vmatpush3.xpose.msra.mxu0 %v31_v14 }
  0x2f   :  { %184 = vmatprep.subr.mxu0 %v199_v0 }
  0x32   :  { %185 = vmatpush3.xpose.msra.mxu0 %v30_v15 }
  0x33   :  { %186 = vmatprep.subr.mxu0 %v199_v0 }
  0x36   :  { %187 = vmatpush3.xpose.msra.mxu0 %v29_v16 }
  0x37   :  { %188 = vmatprep.subr.mxu0 %v199_v0 }
  0x3a   :  { %189 = vmatpush3.xpose.msra.mxu0 %v28_v17 }
  0x3b   :  { %190 = vmatprep.subr.mxu0 %v199_v0 }
  0x3e   :  { %191 = vmatpush3.xpose.msra.mxu0 %v27_v18 }
  0x41   :  { %193 = vmatmul.mubr.f32.vlgmr.msra.gmra.mxu0 %v26_v19 }
  0x7e   :  { %v22_v20 = vpop.permute.xlu0 %21 }
 0x101   :  { %v109_v21 = vpop.f32.mrf.mxu0 }
 0x102   :  { %v113_v22 = vadd.f32 %v109_v21, %v22_v20 }
 0x103   :  { %v194_v23 = vpop.f32.mrf.mxu0 }
 0x104   :  { %v119_v24 = vrot.slane %v113_v22, 4 }
 0x106   :  { %v120_v25 = vmax.f32 %v113_v22, %v119_v24 }
 0x108   :  { %v121_v26 = vrot.slane %v120_v25, 2 }
 0x10a   :  { %v122_v28 = vmax.f32 %v120_v25, %v121_v26 }
 0x10c   :  { %v123_v29 = vrot.slane %v122_v28, 1 }
 0x10e   :  { %v124_v31 = vmax.f32 %v122_v28, %v123_v29 }
 0x110   :  { %vm127_vm1 = vcmp.eq.f32.partialorder %v113_v22, %v124_v31 }
 0x111   :  { %v128_v32 = vsel %vm127_vm1, %v126_v30, 8 }
 0x112   :  { %v129_v33 = vrot.slane %v128_v32, 4 }
 0x114   :  { %vm130_vm2 = vcmp.lt.s32.totalorder %v128_v32, %v129_v33 }
 0x115   :  { %v131_v34 = vsel %vm130_vm2, %v128_v32, %v129_v33 }
 0x116   :  { %v132_v35 = vrot.slane %v131_v34, 2 }
 0x118   :  { %vm133_vm3 = vcmp.lt.s32.totalorder %v131_v34, %v132_v35 }
 0x119   :  { %v134_v36 = vsel %vm133_vm3, %v131_v34, %v132_v35 }
 0x11a   :  { %v135_v37 = vrot.slane %v134_v36, 1 }
 0x11c   :  { %vm136_vm4 = vcmp.lt.s32.totalorder %v134_v36, %v135_v37 }
 0x11d   :  { %v137_v38 = vsel %vm136_vm4, %v134_v36, %v135_v37 }
 0x11e   :  { %138 = vst [vmem:[%s282_s3] sm:$0x1] %v137_v38 }

</bundles_post_ra>
